<compile_context>
chip_gen: v7x
topology: tpu7x:2x2x1
jax: 0.10.0
libtpu: 0.0.40
codegen_flags: <defaults>
</compile_context>

<pallas_src>
import math

import jax
import jax.numpy as jnp
from jax import lax
from jax.experimental import pallas as pl
from jax.experimental.pallas import tpu as pltpu


# ------------------------------ helpers ------------------------------------

def _row_tile(m, target=256):
    """Largest convenient row tile dividing m (target up to 256 rows)."""
    if m <= target:
        return m
    if m % target == 0:
        return target
    t = math.gcd(m, target)
    return t if t >= 8 else m


# ----------------------------- Pallas kernels ------------------------------

def _linear_kernel(x_ref, w_ref, b_ref, o_ref):
    acc = jnp.dot(x_ref[...], w_ref[...], preferred_element_type=jnp.float32)
    o_ref[...] = (acc + b_ref[...]).astype(o_ref.dtype)


def linear(x, w, b, target_tm=256):
    """x:(M,K) @ w:(K,N) + b:(N,), row-tiled over M."""
    M, K = x.shape
    N = w.shape[1]
    tm = _row_tile(M, target_tm)
    return pl.pallas_call(
        _linear_kernel,
        out_shape=jax.ShapeDtypeStruct((M, N), x.dtype),
        grid=(M // tm,),
        in_specs=[
            pl.BlockSpec((tm, K), lambda i: (i, 0)),
            pl.BlockSpec((K, N), lambda i: (0, 0)),
            pl.BlockSpec((1, N), lambda i: (0, 0)),
        ],
        out_specs=pl.BlockSpec((tm, N), lambda i: (i, 0)),
        compiler_params=pltpu.CompilerParams(dimension_semantics=("parallel",)),
    )(x, w, b.reshape(1, N))


def _proj_residual_ln_kernel(x_ref, w_ref, b_ref, r_ref, g_ref, bb_ref, o_ref):
    """out = LayerNorm(x @ w + b + resid) — matmul with LN fused in epilogue."""
    acc = jnp.dot(x_ref[...], w_ref[...], preferred_element_type=jnp.float32)
    y = acc + b_ref[...] + r_ref[...].astype(jnp.float32)
    mean = jnp.mean(y, axis=-1, keepdims=True)
    var = jnp.mean(jnp.square(y - mean), axis=-1, keepdims=True)
    y = (y - mean) * lax.rsqrt(var + 1e-5)
    o_ref[...] = (y * g_ref[...] + bb_ref[...]).astype(o_ref.dtype)


def linear_residual_ln(x, w, b, resid, gamma, beta, target_tm=256):
    M, K = x.shape
    E = w.shape[1]
    tm = _row_tile(M, target_tm)
    return pl.pallas_call(
        _proj_residual_ln_kernel,
        out_shape=jax.ShapeDtypeStruct((M, E), x.dtype),
        grid=(M // tm,),
        in_specs=[
            pl.BlockSpec((tm, K), lambda i: (i, 0)),
            pl.BlockSpec((K, E), lambda i: (0, 0)),
            pl.BlockSpec((1, E), lambda i: (0, 0)),
            pl.BlockSpec((tm, E), lambda i: (i, 0)),
            pl.BlockSpec((1, E), lambda i: (0, 0)),
            pl.BlockSpec((1, E), lambda i: (0, 0)),
        ],
        out_specs=pl.BlockSpec((tm, E), lambda i: (i, 0)),
        compiler_params=pltpu.CompilerParams(dimension_semantics=("parallel",)),
    )(x, w, b.reshape(1, E), resid, gamma.reshape(1, E), beta.reshape(1, E))


def attention_fused(qkv, B, T, H, Dh):
    """Causal multi-head attention on fused QKV activations.

    qkv: (M, 3*H*Dh) with [q | k | v] along the last axis, each head-major.
    Returns (M, H*Dh).  Grid over batch; all heads handled per grid step so the
    output block is lane-dense (width H*Dh) and no XLA transposes are needed.
    """
    HD = H * Dh
    x = qkv.reshape(B, T, 3 * HD)
    scale = 1.0 / math.sqrt(Dh)

    def kernel(qkv_ref, o_ref):
        row = lax.broadcasted_iota(jnp.int32, (T, T), 0)
        col = lax.broadcasted_iota(jnp.int32, (T, T), 1)
        causal = col <= row
        outs = []
        for h in range(H):
            q = qkv_ref[0, :, h * Dh:(h + 1) * Dh]
            k = qkv_ref[0, :, HD + h * Dh:HD + (h + 1) * Dh]
            v = qkv_ref[0, :, 2 * HD + h * Dh:2 * HD + (h + 1) * Dh]
            s = lax.dot_general(q, k, (((1,), (1,)), ((), ())),
                                preferred_element_type=jnp.float32) * scale
            s = jnp.where(causal, s, -1e30)
            p = jax.nn.softmax(s, axis=-1)
            outs.append(jnp.dot(p.astype(v.dtype), v,
                                preferred_element_type=jnp.float32))
        o_ref[0] = jnp.concatenate(outs, axis=-1).astype(o_ref.dtype)

    out = pl.pallas_call(
        kernel,
        out_shape=jax.ShapeDtypeStruct((B, T, HD), qkv.dtype),
        grid=(B,),
        in_specs=[pl.BlockSpec((1, T, 3 * HD), lambda b: (b, 0, 0))],
        out_specs=pl.BlockSpec((1, T, HD), lambda b: (b, 0, 0)),
        compiler_params=pltpu.CompilerParams(dimension_semantics=("parallel",)),
    )(x)
    return out.reshape(B * T, HD)


def _moe_kernel(x_ref, w1_ref, b1_ref, w2_ref, b2_ref, dw_ref, g_ref, bb_ref,
                o_ref, acc_ref):
    """One gate of the MoE block, all experts batched into one wide GEMM.

    Grid = (M_tiles, n_gates); gate axis is a trailing reduction ("arbitrary").
    Finalize applies mean-over-gates, residual add and LayerNorm2.
    """
    gate = pl.program_id(1)

    @pl.when(gate == 0)
    def _():
        acc_ref[...] = jnp.zeros_like(acc_ref)

    x = x_ref[...]                                                   # (tm, E)
    # Wide first matmul: (tm, E) @ (E, NE*Hd)
    h = jnp.dot(x, w1_ref[0], preferred_element_type=jnp.float32) + b1_ref[0]
    h = jnp.maximum(h, 0.0)                                          # ReLU
    dw = dw_ref[0].astype(jnp.float32)                               # (tm, NE)

    nh = h.shape[-1]
    ne = dw.shape[-1]
    hd = nh // ne
    # Expand per-expert combine weights to the hidden width via a tiny MXU dot.
    erow = lax.broadcasted_iota(jnp.int32, (ne, nh), 0)
    ecol = lax.broadcasted_iota(jnp.int32, (ne, nh), 1)
    expand = (erow == ecol // hd).astype(jnp.float32)                # (NE, NE*Hd)
    w_scale = jnp.dot(dw, expand, preferred_element_type=jnp.float32)  # (tm, NE*Hd)

    out = jnp.dot((h * w_scale).astype(w2_ref.dtype), w2_ref[0],
                  preferred_element_type=jnp.float32)                # (tm, E)
    out = out + jnp.dot(dw, b2_ref[0].astype(jnp.float32),
                        preferred_element_type=jnp.float32)          # weighted b2
    acc_ref[...] += out

    @pl.when(gate == pl.num_programs(1) - 1)
    def _():
        n_gates = pl.num_programs(1)
        y = acc_ref[...] / n_gates + x.astype(jnp.float32)           # residual
        mean = jnp.mean(y, axis=-1, keepdims=True)
        var = jnp.mean(jnp.square(y - mean), axis=-1, keepdims=True)
        y = (y - mean) * lax.rsqrt(var + 1e-5)
        o_ref[...] = (y * g_ref[...] + bb_ref[...]).astype(o_ref.dtype)


def moe_experts_residual_ln(x, w1, b1, w2, b2, dense_w, gamma, beta,
                            target_tm=256):
    """x:(M,E); w1:(NG,E,NE*Hd); b1:(NG,1,NE*Hd); w2:(NG,NE*Hd,E);
       b2:(NG,NE,E); dense_w:(NG,M,NE) -> LayerNorm(mean_g(moe_g(x)) + x)."""
    M, E = x.shape
    NG, _, NH = w1.shape
    NE = dense_w.shape[-1]
    tm = _row_tile(M, target_tm)
    return pl.pallas_call(
        _moe_kernel,
        out_shape=jax.ShapeDtypeStruct((M, E), x.dtype),
        grid=(M // tm, NG),
        in_specs=[
            pl.BlockSpec((tm, E), lambda i, g: (i, 0)),
            pl.BlockSpec((1, E, NH), lambda i, g: (g, 0, 0)),
            pl.BlockSpec((1, 1, NH), lambda i, g: (g, 0, 0)),
            pl.BlockSpec((1, NH, E), lambda i, g: (g, 0, 0)),
            pl.BlockSpec((1, NE, E), lambda i, g: (g, 0, 0)),
            pl.BlockSpec((1, tm, NE), lambda i, g: (g, i, 0)),
            pl.BlockSpec((1, E), lambda i, g: (0, 0)),
            pl.BlockSpec((1, E), lambda i, g: (0, 0)),
        ],
        out_specs=pl.BlockSpec((tm, E), lambda i, g: (i, 0)),
        scratch_shapes=[pltpu.VMEM((tm, E), jnp.float32)],
        compiler_params=pltpu.CompilerParams(
            dimension_semantics=("parallel", "arbitrary")),
    )(x, w1, b1, w2, b2, dense_w, gamma.reshape(1, E), beta.reshape(1, E))


# ------------------------------ model (glue) -------------------------------

def init_model(key, cfg):
    E, V, T = cfg["embedding_dim"], cfg["vocab_size"], cfg["seq_len"]
    H, Dh = cfg["num_head"], cfg["head_dim"]
    NE, NG, MH, NB = (cfg["n_experts"], cfg["n_gates"], cfg["moe_dim"],
                      cfg["n_encoder_blocks"])
    keys = iter(jax.random.split(key, 4096))

    def nrm(shape, scale=0.02):
        return scale * jax.random.normal(next(keys), shape, jnp.float32)

    params = {
        "tok_emb": nrm((V, E)),
        "pos_emb": nrm((T, E)),
        "lm_head_w": nrm((E, V)),
        "lm_head_b": jnp.zeros((V,), jnp.float32),
        "blocks": [],
    }
    for _ in range(NB):
        blk = {
            # fused QKV projection (lane-dense N = 3*H*Dh)
            "wqkv": nrm((E, 3 * H * Dh)),
            "bqkv": jnp.zeros((3 * H * Dh,), jnp.float32),
            "wo": nrm((H * Dh, E)), "bo": jnp.zeros((E,), jnp.float32),
            "ln1_g": jnp.ones((E,), jnp.float32), "ln1_b": jnp.zeros((E,), jnp.float32),
            "ln2_g": jnp.ones((E,), jnp.float32), "ln2_b": jnp.zeros((E,), jnp.float32),
            # per-gate routers, stacked
            "router_w": nrm((NG, E, NE)),
            "router_b": jnp.zeros((NG, NE), jnp.float32),
            # experts batched along the hidden dim: column block e*MH:(e+1)*MH
            # of w1 / row block of w2 belongs to expert e.
            "w1": nrm((NG, E, NE * MH)),
            "b1": jnp.zeros((NG, 1, NE * MH), jnp.float32),
            "w2": nrm((NG, NE * MH, E)),
            "b2": jnp.zeros((NG, NE, E), jnp.float32),
        }
        params["blocks"].append(blk)
    return params


def router_combine(x, router_w, router_b, top_k):
    """Per-gate routing: full softmax (returned) + top-k softmax combine weights.

    Tiny (N = n_experts) matmuls — kept in XLA; a Pallas kernel with lane width
    n_experts would be pure masked-store overhead.
    """
    # TODO(synk): top-k combine uses softmax over top-k logits (routing inferred).
    logits = jnp.einsum("me,gen->gmn", x, router_w) + router_b[:, None, :]
    probs = jax.nn.softmax(logits, axis=-1)                           # (NG, M, NE)
    topv, topi = lax.top_k(logits, top_k)                             # (NG, M, k)
    topw = jax.nn.softmax(topv, axis=-1)
    ne = router_w.shape[-1]
    dense_w = jnp.sum(jax.nn.one_hot(topi, ne, dtype=x.dtype)
                      * topw[..., None].astype(x.dtype), axis=-2)      # (NG, M, NE)
    return dense_w, probs


def mha_residual_ln(x, blk, B, T, H, Dh):
    """normed = LayerNorm1( MHA(x) + x ), all Pallas."""
    qkv = linear(x, blk["wqkv"], blk["bqkv"])                          # (M, 3*H*Dh)
    attn = attention_fused(qkv, B, T, H, Dh)                           # (M, H*Dh)
    return linear_residual_ln(attn, blk["wo"], blk["bo"], x,
                              blk["ln1_g"], blk["ln1_b"])


def moe_residual_ln(x, blk, cfg, B, T):
    M, _ = x.shape
    NG, _, NE = blk["router_w"].shape
    dense_w, probs = router_combine(x, blk["router_w"], blk["router_b"],
                                    cfg["top_k_experts"])
    out = moe_experts_residual_ln(x, blk["w1"], blk["b1"], blk["w2"], blk["b2"],
                                  dense_w, blk["ln2_g"], blk["ln2_b"])
    gates_respond = probs.reshape(NG, B, T, NE)
    return out, gates_respond


def encoder_block_forward(x, blk, cfg, B, T):
    normed = mha_residual_ln(x, blk, B, T, cfg["num_head"], cfg["head_dim"])
    out, gates = moe_residual_ln(normed, blk, cfg, B, T)
    return out, gates


def moe_transformer_encoder(params, tokens, cfg):
    B, T = tokens.shape
    E, V = cfg["embedding_dim"], cfg["vocab_size"]
    x = params["tok_emb"][tokens] + params["pos_emb"][:T][None]        # (B, T, E)
    h = x.reshape(B * T, E)
    gate_responds = []
    for blk in params["blocks"]:
        h, g = encoder_block_forward(h, blk, cfg, B, T)
        gate_responds.append(g)
    preds = linear(h, params["lm_head_w"], params["lm_head_b"]).reshape(B, T, V)
    gate_respond = jnp.concatenate(gate_responds, axis=0)              # cat over blocks
    return preds, gate_respond


# ----------------------------------- main -----------------------------------

if __name__ == "__main__":
    cfg = dict(
        vocab_size=64,
        embedding_dim=32,
        seq_len=8,
        num_head=2,
        head_dim=16,
        n_experts=4,
        n_gates=2,
        n_encoder_blocks=2,
        moe_dim=32,
        top_k_experts=2,
    )
    key = jax.random.PRNGKey(0)
    pkey, tkey = jax.random.split(key)
    params = init_model(pkey, cfg)
    tokens = jax.random.randint(tkey, (2, cfg["seq_len"]), 0,
                                cfg["vocab_size"], dtype=jnp.int32)

    preds, gate_respond = moe_transformer_encoder(params, tokens, cfg)
    jax.block_until_ready((preds, gate_respond))

    assert preds.shape == (2, cfg["seq_len"], cfg["vocab_size"])
    assert gate_respond.shape == (cfg["n_encoder_blocks"] * cfg["n_gates"], 2,
                                  cfg["seq_len"], cfg["n_experts"])
    assert bool(jnp.all(jnp.isfinite(preds)))
    print("KERNEL_OK")
</pallas_src>

<mosaic_0001>
module attributes {stable_mosaic.version = 11 : i64} {
  func.func @_linear_kernel(%arg0: i32, %arg1: memref<16x32xf32, #tpu.memory_space<vmem>>, %arg2: memref<32x96xf32, #tpu.memory_space<vmem>>, %arg3: memref<1x96xf32, #tpu.memory_space<vmem>>, %arg4: memref<16x96xf32, #tpu.memory_space<vmem>>) attributes {dimension_semantics = [#tpu.dimension_semantics<parallel>], iteration_bounds = array<i64: 1>, scalar_prefetch = 0 : i64, scratch_operands = 0 : i64, tpu.core_type = #tpu.core_type<tc>, window_params = [{transform_indices = @transform_0, window_bounds = array<i64: 16, 32>}, {pipeline_mode = #tpu.pipeline_mode<synchronous>, transform_indices = @transform_1, window_bounds = array<i64: 32, 96>}, {pipeline_mode = #tpu.pipeline_mode<synchronous>, transform_indices = @transform_2, window_bounds = array<i64: 1, 96>}, {transform_indices = @transform_3, window_bounds = array<i64: 16, 96>}]} {
    %c0 = arith.constant 0 : index
    %c0_0 = arith.constant 0 : index
    %0 = vector.load %arg1[%c0, %c0_0] : memref<16x32xf32, #tpu.memory_space<vmem>>, vector<16x32xf32>
    %c0_1 = arith.constant 0 : index
    %c0_2 = arith.constant 0 : index
    %1 = vector.load %arg2[%c0_1, %c0_2] : memref<32x96xf32, #tpu.memory_space<vmem>>, vector<32x96xf32>
    %cst = arith.constant dense<0.000000e+00> : vector<16x96xf32>
    %2 = tpu.matmul %0, %1, %cst {dimension_numbers = #tpu.dot_dimension_numbers<[1], [0], [0], [1], [0, 0, 1, 1], [], []>} : vector<16x32xf32>, vector<32x96xf32>, vector<16x96xf32> -> vector<16x96xf32>
    %c0_3 = arith.constant 0 : index
    %c0_4 = arith.constant 0 : index
    %3 = vector.load %arg3[%c0_3, %c0_4] : memref<1x96xf32, #tpu.memory_space<vmem>>, vector<1x96xf32>
    %4 = vector.broadcast %3 : vector<1x96xf32> to vector<16x96xf32>
    %5 = arith.addf %2, %4 : vector<16x96xf32>
    %c0_5 = arith.constant 0 : index
    %c0_6 = arith.constant 0 : index
    %6 = vector.load %arg4[%c0_5, %c0_6] : memref<16x96xf32, #tpu.memory_space<vmem>>, vector<16x96xf32>
    tpu.vector_store %arg4[%c0_5, %c0_6], %5 {strides = array<i32>} : memref<16x96xf32, #tpu.memory_space<vmem>>, vector<16x96xf32>,
    return
  }
  func.func @transform_0(%arg0: i32) -> (i32, i32) {
    %c0_i32 = arith.constant 0 : i32
    %c0_i32_0 = arith.constant 0 : i32
    return %arg0, %c0_i32 : i32, i32
  }
  func.func @transform_1(%arg0: i32) -> (i32, i32) {
    %c0_i32 = arith.constant 0 : i32
    %c0_i32_0 = arith.constant 0 : i32
    %c0_i32_1 = arith.constant 0 : i32
    return %c0_i32, %c0_i32_0 : i32, i32
  }
  func.func @transform_2(%arg0: i32) -> (i32, i32) {
    %c0_i32 = arith.constant 0 : i32
    %c0_i32_0 = arith.constant 0 : i32
    %c0_i32_1 = arith.constant 0 : i32
    return %c0_i32, %c0_i32_0 : i32, i32
  }
  func.func @transform_3(%arg0: i32) -> (i32, i32) {
    %c0_i32 = arith.constant 0 : i32
    %c0_i32_0 = arith.constant 0 : i32
    return %arg0, %c0_i32 : i32, i32
  }
}

</mosaic_0001>

<bundles_post_ra>
// kernel: tpu_custom_call.1
= control target key start
LH: loop header
LB: loop body
LE: loop exit
PB: predicated region body
PF: predicated region fallthrough
CT: control target
= control target key end

     0   :  { %8 = vsyncpa [#allocation3], 0  ;;  %s337_s0 = inlined_call_operand.hbm [shape: f32[16,32], index: 0, kind: input, shape index: {}]   ;;  %s338_s1 = inlined_call_operand.hbm [shape: f32[32,96], index: 1, kind: input, shape index: {}]   ;;  %s339_s2 = inlined_call_operand.vmem [shape: f32[1,96], index: 2, kind: input, shape index: {}]   ;;  %s340_s3 = inlined_call_operand.hbm [shape: f32[16,96], index: 3, kind: output, shape index: {}]  }
   0x1   :  { %9 = vsyncpa [#allocation6], 0 }
   0x2   :  { %10 = vsyncpa [#allocation4], 0  ;;  %s264_s12 = smov [#allocation2]   ;;  %s192_s16 = scalar_lea.hbm %s337_s0, 256 }
   0x3   :  { %s16_s13 = sshll.u32 %s264_s12, 4  ;;  %p193_p0 = scmp.ne.s32.totalorder %s337_s0, %s192_s16  ;;  %s17_s13 = int_to_ptr.vmem [resolvable:$true] %s16_s13 }
   0x4   :  { %p196_p1 = scmp.lt.u32.totalorder %s192_s16, %s337_s0 }
   0x6   :  { %p198_p2 = pnand %p196_p1, %p193_p0 }
   0x8   :  { %201 = shalt.err (!%p198_p2)
}
   0x9   :  { %s202_s21 = scalar_lea.vmem %s17_s13, 256  ;;  %p207_p4 = scmp.lt.s32.totalorder %s17_s13, %s17_s13 }
   0xa   :  { %p203_p3 = scmp.ne.s32.totalorder %s17_s13, %s202_s21  ;;  %p208_p5 = scmp.lt.s32.totalorder %s202_s21, %s202_s21 }
   0xc   :  { %p209_p6 = por %p208_p5, %p207_p4 }
   0xe   :  { %p210_p7 = pnand %p209_p6, %p203_p3 }
  0x10   :  { %213 = shalt.err (!%p210_p7)
}
  0x11   :  { %s265_s22 = smov 128   ;;  %s266_s23 = smov 8  }
  0x12   :  { %22 = dma.hbm_to_vmem [thread:$0]  %s337_s0, 256, %s17_s13, [#allocation3], %s265_s22, %s265_s22, %s266_s23  }
  0x13   :  { %s267_s26 = smov [#allocation5]   ;;  %s214_s30 = scalar_lea.hbm %s338_s1, 512 }
  0x14   :  { %s28_s27 = sshll.u32 %s267_s26, 4  ;;  %p215_p8 = scmp.ne.s32.totalorder %s338_s1, %s214_s30  ;;  %s29_s27 = int_to_ptr.vmem [resolvable:$true] %s28_s27 }
  0x15   :  { %p218_p9 = scmp.lt.u32.totalorder %s214_s30, %s338_s1 }
  0x17   :  { %p220_p10 = pnand %p218_p9, %p215_p8 }
  0x19   :  { %223 = shalt.err (!%p220_p10)
}
  0x1a   :  { %s224_s8 = scalar_lea.vmem %s29_s27, 512  ;;  %p229_p12 = scmp.lt.s32.totalorder %s29_s27, %s29_s27 }
  0x1b   :  { %p225_p11 = scmp.ne.s32.totalorder %s29_s27, %s224_s8  ;;  %p230_p13 = scmp.lt.s32.totalorder %s224_s8, %s224_s8 }
  0x1d   :  { %p231_p0 = por %p230_p13, %p229_p12 }
  0x1f   :  { %p232_p1 = pnand %p231_p0, %p225_p11 }
  0x21   :  { %235 = shalt.err (!%p232_p1)
}
  0x22   :  { %34 = dma.hbm_to_vmem [thread:$0]  %s338_s1, 512, %s29_s27, [#allocation6], %s265_s22, %s265_s22, %s266_s23  }
  0x23   :  { %258 = dma.done.wait [#allocation3], 256  }
  0x24   :  { %259 = vsyncadd [#allocation3], 4294967040 }
  0x25   :  { %260 = dma.done.wait [#allocation6], 512  }
  0x26   :  { %261 = vsyncadd [#allocation6], 4294966784  ;;  %vm56_vm0 = vcmask 261120   ;;  %v45_v0 = vld [vmem:[#allocation5] sm:$0xff]  ;;  %v46_v1 = vld [vmem:[#allocation5 + $0x8] sm:$0xff]  ;;  %s268_s11 = smov [#allocation7]  }
  0x27   :  { %v47_v2 = vld [vmem:[#allocation5 + $0x10] sm:$0xff]  ;;  %v179_v3 = vpack.c.bf16 %v46_v1, %v45_v0  ;;  %v48_v4 = vld [vmem:[#allocation5 + $0x18] sm:$0xff]  ;;  %s146_s12 = sshll.u32 %s268_s11, 4  ;;  %vm138_vm1 = vcmask 785408   ;;  %s147_s12 = int_to_ptr.vmem [resolvable:$true] %s146_s12 }
  0x28   :  { %v43_v5 = vld [vmem:[#allocation2] sm:$0xff]  ;;  %v183_v6 = vpack.c.bf16 %v48_v4, %v47_v2  ;;  %v44_v7 = vld [vmem:[#allocation2 + $0x8] sm:$0xff]  ;;  %s236_s13 = scalar_lea.vmem %s147_s12, 256  ;;  %p241_p3 = scmp.lt.s32.totalorder %s147_s12, %s147_s12 }
  0x29   :  { %176 = vmatprep.mubr.msk.f32.mxu0 %vm56_vm0, %v43_v5  ;;  %180 = vmatprep.subr.bf16.mxu0 %v179_v3  ;;  %v159_v8 = vld [vmem:[%s339_s2] ss:$0 sm:$0xff]  ;;  %p237_p2 = scmp.ne.s32.totalorder %s147_s12, %s236_s13  ;;  %p242_p4 = scmp.lt.s32.totalorder %s236_s13, %s236_s13 }
  0x2a   :  { %182 = vmatpush3.bf16.msra.mxu0 %v179_v3 }
  0x2b   :  { %184 = vmatprep.subr.bf16.mxu0 %v183_v6  ;;  %p243_p5 = por %p242_p4, %p241_p3 }
  0x2d   :  { %p244_p6 = pnand %p243_p5, %p237_p2 }
  0x2e   :  { %186 = vmatpush3.bf16.msra.mxu0 %v183_v6 }
  0x31   :  { %177 = vmatmul.mubr.msk.f32.vlgmr.msra.gmra.mrb[0].mxu0 %vm56_vm0, %v44_v7 }
 0x104   :  { %v178_v9 = vpop.f32.mrb[0].mxu0 }
 0x105   :  { %v135_v10 = vadd.f32 %v178_v9, %v159_v8  ;;  %v129_v11 = vpop.f32.mrb[1].mxu0 }
 0x106   :  { %v130_v12 = vadd.f32 %v159_v8, %v129_v11 }
 0x107   :  { %140 = vst.msk [vmem:[#allocation7 + $0x8] sm:$0xff] %vm138_vm1, %v135_v10 }
 0x108   :  { %139 = vst.msk [vmem:[#allocation7] sm:$0xff] %vm138_vm1, %v130_v12 }
 0x109   :  { %247 = shalt.err (!%p244_p6)
}
 0x10a   :  { %s248_s2 = scalar_lea.hbm %s340_s3, 256 }
 0x10b   :  { %p249_p7 = scmp.ne.s32.totalorder %s340_s3, %s248_s2  ;;  %p252_p8 = scmp.lt.u32.totalorder %s248_s2, %s340_s3 }
 0x10d   :  { %p254_p9 = pnand %p252_p8, %p249_p7 }
 0x10f   :  { %257 = shalt.err (!%p254_p9)
}
 0x110   :  { %152 = dma.vmem_to_hbm [thread:$0]  %s147_s12, 256, %s340_s3, [#allocation4], %s265_s22, %s265_s22, %s266_s23  }
 0x111   :  { %262 = dma.done.wait [#allocation4], 256  }
 0x112   :  { %263 = vsyncadd [#allocation4], 4294967040 }
 0x113   :  { %156 = vsyncpa [#allocation3], 1 }
 0x114   :  { %157 = vsyncpa [#allocation6], 1 }
 0x115   :  { %158 = vsyncpa [#allocation4], 1 }

</bundles_post_ra>
